<compile_context>
chip_gen: v5e
topology: v5e:2x2
jax: 0.10.0
libtpu: 0.0.40
codegen_flags: <defaults>
</compile_context>

<pallas_src>
import jax
import jax.numpy as jnp
from jax.experimental import pallas as pl
from jax.experimental.pallas import tpu as pltpu

# Static problem sizes (fixed by the module definition).
_B, _F, _H, _O = 2, 3, 2, 2   # batch, in_features, fc1 out_features, fc2 out_features


def dummy_kernel(x_ref, w1_ref, w2_ref, out_ref):
    # x_ref:  (B*F,) f32 in SMEM   (row-major x[b, j])
    # w1_ref: (H*F,) f32 in SMEM   (row-major W1[h, j])
    # w2_ref: (O*H,) f32 in SMEM   (row-major W2[o, h])
    # out_ref: (1, 1) f32 in SMEM
    total = None
    for b in range(_B):                      # fully unrolled at trace time
        # r1[b, h] = sum_j x[b, j] * W1[h, j]
        r1 = []
        for h in range(_H):
            acc = x_ref[b * _F] * w1_ref[h * _F]
            for j in range(1, _F):
                acc = acc + x_ref[b * _F + j] * w1_ref[h * _F + j]
            r1.append(acc)
        # r2[b, o] = sum_h r1[b, h] * W2[o, h];  total += r2[b, o]
        for o in range(_O):
            acc = r1[0] * w2_ref[o * _H]
            for h in range(1, _H):
                acc = acc + r1[h] * w2_ref[o * _H + h]
            total = acc if total is None else total + acc
    out_ref[0, 0] = total


def dummy_forward(x, w1, w2):
    """x: (B, 3) f32, w1: (2, 3) f32, w2: (2, 2) f32 -> scalar f32.

    Numerically identical to DummyModule.forward(x) = ((x @ w1.T) @ w2.T).sum().
    """
    x = jnp.asarray(x, jnp.float32).reshape(-1)    # (B*F,)  — reshape is metadata only
    w1 = jnp.asarray(w1, jnp.float32).reshape(-1)  # (H*F,)
    w2 = jnp.asarray(w2, jnp.float32).reshape(-1)  # (O*H,)

    out = pl.pallas_call(
        dummy_kernel,
        out_shape=jax.ShapeDtypeStruct((1, 1), jnp.float32),
        in_specs=[
            pl.BlockSpec(memory_space=pltpu.MemorySpace.SMEM),
            pl.BlockSpec(memory_space=pltpu.MemorySpace.SMEM),
            pl.BlockSpec(memory_space=pltpu.MemorySpace.SMEM),
        ],
        out_specs=pl.BlockSpec(memory_space=pltpu.MemorySpace.SMEM),
        cost_estimate=pl.CostEstimate(
            flops=2 * (_B * _H * _F + _B * _O * _H) + _B * _O,
            transcendentals=0,
            bytes_accessed=4 * (_B * _F + _H * _F + _O * _H + 1),
        ),
    )(x, w1, w2)
    return out[0, 0]


# TODO(synk): only the forward pass is implemented; the grad-hook behaviour of
# the original test (hooks on fc1/fc2 grads) would require a jax.custom_vjp
# around dummy_forward and has no direct Pallas equivalent here.

if __name__ == "__main__":
    key = jax.random.PRNGKey(0)  # seed only for reproducibility convention; module hard-codes values

    x = jnp.array([[1.0, 2.0, 3.0],
                   [1.0, 5.0, 6.0]], dtype=jnp.float32)      # input (2, 3)
    w1 = jnp.array([[1.0, 2.0, 3.0],
                    [4.0, 5.0, 6.0]], dtype=jnp.float32)     # fc1.weight (2, 3)
    w2 = jnp.array([[1.0, 2.0],
                    [3.0, 4.0]], dtype=jnp.float32)          # fc2.weight (2, 2)

    result = jax.block_until_ready(dummy_forward(x, w1, w2))

    # Pure-JAX reference: r2.sum() with r2 = (x @ W1.T) @ W2.T
    ref = jnp.sum((x @ w1.T) @ w2.T)
    assert jnp.allclose(result, ref, rtol=1e-6, atol=1e-6), (result, ref)

    print("KERNEL_OK")
</pallas_src>

<mosaic_0001>
module attributes {stable_mosaic.version = 11 : i64} {
  func.func @dummy_kernel(%arg0: memref<6xf32, #tpu.memory_space<smem>>, %arg1: memref<6xf32, #tpu.memory_space<smem>>, %arg2: memref<4xf32, #tpu.memory_space<smem>>, %arg3: memref<1x1xf32, #tpu.memory_space<smem>>) attributes {dimension_semantics = [], scalar_prefetch = 0 : i64, scratch_operands = 0 : i64, tpu.core_type = #tpu.core_type<tc>} {
    %c0 = arith.constant 0 : index
    %0 = memref.load %arg0[%c0] : memref<6xf32, #tpu.memory_space<smem>>
    %c0_0 = arith.constant 0 : index
    %1 = memref.load %arg1[%c0_0] : memref<6xf32, #tpu.memory_space<smem>>
    %2 = arith.mulf %0, %1 : f32
    %c1 = arith.constant 1 : index
    %3 = memref.load %arg0[%c1] : memref<6xf32, #tpu.memory_space<smem>>
    %c1_1 = arith.constant 1 : index
    %4 = memref.load %arg1[%c1_1] : memref<6xf32, #tpu.memory_space<smem>>
    %5 = arith.mulf %3, %4 : f32
    %6 = arith.addf %2, %5 : f32
    %c2 = arith.constant 2 : index
    %7 = memref.load %arg0[%c2] : memref<6xf32, #tpu.memory_space<smem>>
    %c2_2 = arith.constant 2 : index
    %8 = memref.load %arg1[%c2_2] : memref<6xf32, #tpu.memory_space<smem>>
    %9 = arith.mulf %7, %8 : f32
    %10 = arith.addf %6, %9 : f32
    %c0_3 = arith.constant 0 : index
    %11 = memref.load %arg0[%c0_3] : memref<6xf32, #tpu.memory_space<smem>>
    %c3 = arith.constant 3 : index
    %12 = memref.load %arg1[%c3] : memref<6xf32, #tpu.memory_space<smem>>
    %13 = arith.mulf %11, %12 : f32
    %c1_4 = arith.constant 1 : index
    %14 = memref.load %arg0[%c1_4] : memref<6xf32, #tpu.memory_space<smem>>
    %c4 = arith.constant 4 : index
    %15 = memref.load %arg1[%c4] : memref<6xf32, #tpu.memory_space<smem>>
    %16 = arith.mulf %14, %15 : f32
    %17 = arith.addf %13, %16 : f32
    %c2_5 = arith.constant 2 : index
    %18 = memref.load %arg0[%c2_5] : memref<6xf32, #tpu.memory_space<smem>>
    %c5 = arith.constant 5 : index
    %19 = memref.load %arg1[%c5] : memref<6xf32, #tpu.memory_space<smem>>
    %20 = arith.mulf %18, %19 : f32
    %21 = arith.addf %17, %20 : f32
    %c0_6 = arith.constant 0 : index
    %22 = memref.load %arg2[%c0_6] : memref<4xf32, #tpu.memory_space<smem>>
    %23 = arith.mulf %10, %22 : f32
    %c1_7 = arith.constant 1 : index
    %24 = memref.load %arg2[%c1_7] : memref<4xf32, #tpu.memory_space<smem>>
    %25 = arith.mulf %21, %24 : f32
    %26 = arith.addf %23, %25 : f32
    %c2_8 = arith.constant 2 : index
    %27 = memref.load %arg2[%c2_8] : memref<4xf32, #tpu.memory_space<smem>>
    %28 = arith.mulf %10, %27 : f32
    %c3_9 = arith.constant 3 : index
    %29 = memref.load %arg2[%c3_9] : memref<4xf32, #tpu.memory_space<smem>>
    %30 = arith.mulf %21, %29 : f32
    %31 = arith.addf %28, %30 : f32
    %32 = arith.addf %26, %31 : f32
    %c3_10 = arith.constant 3 : index
    %33 = memref.load %arg0[%c3_10] : memref<6xf32, #tpu.memory_space<smem>>
    %c0_11 = arith.constant 0 : index
    %34 = memref.load %arg1[%c0_11] : memref<6xf32, #tpu.memory_space<smem>>
    %35 = arith.mulf %33, %34 : f32
    %c4_12 = arith.constant 4 : index
    %36 = memref.load %arg0[%c4_12] : memref<6xf32, #tpu.memory_space<smem>>
    %c1_13 = arith.constant 1 : index
    %37 = memref.load %arg1[%c1_13] : memref<6xf32, #tpu.memory_space<smem>>
    %38 = arith.mulf %36, %37 : f32
    %39 = arith.addf %35, %38 : f32
    %c5_14 = arith.constant 5 : index
    %40 = memref.load %arg0[%c5_14] : memref<6xf32, #tpu.memory_space<smem>>
    %c2_15 = arith.constant 2 : index
    %41 = memref.load %arg1[%c2_15] : memref<6xf32, #tpu.memory_space<smem>>
    %42 = arith.mulf %40, %41 : f32
    %43 = arith.addf %39, %42 : f32
    %c3_16 = arith.constant 3 : index
    %44 = memref.load %arg0[%c3_16] : memref<6xf32, #tpu.memory_space<smem>>
    %c3_17 = arith.constant 3 : index
    %45 = memref.load %arg1[%c3_17] : memref<6xf32, #tpu.memory_space<smem>>
    %46 = arith.mulf %44, %45 : f32
    %c4_18 = arith.constant 4 : index
    %47 = memref.load %arg0[%c4_18] : memref<6xf32, #tpu.memory_space<smem>>
    %c4_19 = arith.constant 4 : index
    %48 = memref.load %arg1[%c4_19] : memref<6xf32, #tpu.memory_space<smem>>
    %49 = arith.mulf %47, %48 : f32
    %50 = arith.addf %46, %49 : f32
    %c5_20 = arith.constant 5 : index
    %51 = memref.load %arg0[%c5_20] : memref<6xf32, #tpu.memory_space<smem>>
    %c5_21 = arith.constant 5 : index
    %52 = memref.load %arg1[%c5_21] : memref<6xf32, #tpu.memory_space<smem>>
    %53 = arith.mulf %51, %52 : f32
    %54 = arith.addf %50, %53 : f32
    %c0_22 = arith.constant 0 : index
    %55 = memref.load %arg2[%c0_22] : memref<4xf32, #tpu.memory_space<smem>>
    %56 = arith.mulf %43, %55 : f32
    %c1_23 = arith.constant 1 : index
    %57 = memref.load %arg2[%c1_23] : memref<4xf32, #tpu.memory_space<smem>>
    %58 = arith.mulf %54, %57 : f32
    %59 = arith.addf %56, %58 : f32
    %60 = arith.addf %32, %59 : f32
    %c2_24 = arith.constant 2 : index
    %61 = memref.load %arg2[%c2_24] : memref<4xf32, #tpu.memory_space<smem>>
    %62 = arith.mulf %43, %61 : f32
    %c3_25 = arith.constant 3 : index
    %63 = memref.load %arg2[%c3_25] : memref<4xf32, #tpu.memory_space<smem>>
    %64 = arith.mulf %54, %63 : f32
    %65 = arith.addf %62, %64 : f32
    %66 = arith.addf %60, %65 : f32
    %c0_26 = arith.constant 0 : index
    %c0_27 = arith.constant 0 : index
    %67 = memref.load %arg3[%c0_26, %c0_27] : memref<1x1xf32, #tpu.memory_space<smem>>
    memref.store %66, %arg3[%c0_26, %c0_27] : memref<1x1xf32, #tpu.memory_space<smem>>
    return
  }
}

</mosaic_0001>

<bundles_post_ra>
// kernel: tpu_custom_call.1
= control target key start
LH: loop header
LB: loop body
LE: loop exit
PB: predicated region body
PF: predicated region fallthrough
CT: control target
= control target key end

     0   :  { %s272_s0 = inlined_call_operand.hbm [shape: f32[6], index: 0, kind: input, shape index: {}]   ;;  %s273_s1 = inlined_call_operand.hbm [shape: f32[6], index: 1, kind: input, shape index: {}]   ;;  %s274_s2 = inlined_call_operand.vmem [shape: f32[4], index: 2, kind: input, shape index: {}]   ;;  %s275_s3 = inlined_call_operand.hbm [shape: f32[1,1], index: 3, kind: output, shape index: {}]  }
   0x1   :  { %276 = sst [smem:[#allocation14_spill]] %s275_s3 }
   0x2   :  { %8 = vsyncpa [#allocation3], 0 }
   0x3   :  { %9 = vsyncpa [#allocation7], 0 }
   0x4   :  { %10 = vsyncpa [#allocation5], 0 }
   0x5   :  { %11 = vsyncpa [#allocation4], 0  ;;  %s17_s14 = sshll.u32 %s272_s0, 4  ;;  %s26_s17 = sshll.u32 %s273_s1, 4  ;;  %s18_s14 = int_to_ptr.hbm [resolvable:$true] %s17_s14  ;;  %s27_s17 = int_to_ptr.hbm [resolvable:$true] %s26_s17 }
   0x6   :  { %s196_s18 = smov [#allocation2]   ;;  %s197_s19 = smov [#allocation6]  }
   0x7   :  { %20 = dma.hbm_to_smem %s18_s14, 16, %s196_s18, [#allocation3]  }
   0x8   :  { %29 = dma.hbm_to_smem %s27_s17, 16, %s197_s19, [#allocation7]  }
   0x9   :  { %s35_s22 = sshll.u32 %s274_s2, 4  ;;  %s198_s23 = smov [#allocation8]   ;;  %s36_s22 = int_to_ptr.vmem [resolvable:$true] %s35_s22 }
   0xa   :  { %38 = dma.vmem_to_smem %s36_s22, 16, %s198_s23, [#allocation5]  }
   0xb   :  { %188 = dma.done.wait [#allocation3], 16  }
   0xc   :  { %189 = vsyncadd [#allocation3], 4294967280 }
   0xd   :  { %190 = dma.done.wait [#allocation7], 16  }
   0xe   :  { %191 = vsyncadd [#allocation7], 4294967280 }
   0xf   :  { %192 = dma.done.wait [#allocation5], 16  }
  0x10   :  { %193 = vsyncadd [#allocation5], 4294967280 }
  0x11   :  { %51 = sfence }
  0x12   :  { %s52_s0 = sld [smem:[#allocation2]] }
  0x13   :  { %s229_s1 = sld [smem:[#allocation6]] }
  0x14   :  { %s123_s24 = sld [smem:[#allocation2 + $0x1]] }
  0x15   :  { %s231_s25 = sld [smem:[#allocation6 + $0x1]] }
  0x16   :  { %s125_s26 = sld [smem:[#allocation2 + $0x2]] }
  0x17   :  { %s233_s2 = sld [smem:[#allocation6 + $0x2]] }
  0x18   :  { %s235_s27 = sld [smem:[#allocation6 + $0x3]] }
  0x19   :  { %s54_s28 = smul.f32 %s229_s1, %s52_s0  ;;  %s238_s29 = sld [smem:[#allocation6 + $0x4]] }
  0x1a   :  { %s240_s30 = sld [smem:[#allocation6 + $0x5]] }
  0x1b   :  { %s57_s4 = smul.f32 %s231_s25, %s123_s24  ;;  %s243_s5 = sld [smem:[#allocation8]] }
  0x1c   :  { %s245_s6 = sld [smem:[#allocation8 + $0x1]] }
  0x1d   :  { %s58_s7 = sadd.f32 %s57_s4, %s54_s28  ;;  %s61_s8 = smul.f32 %s233_s2, %s125_s26 }
  0x1e   :  { %s64_s9 = smul.f32 %s235_s27, %s52_s0  ;;  %s249_s10 = sld [smem:[#allocation8 + $0x2]] }
  0x1f   :  { %s62_s11 = sadd.f32 %s61_s8, %s58_s7  ;;  %s66_s12 = smul.f32 %s238_s29, %s123_s24 }
  0x20   :  { %s69_s13 = smul.f32 %s240_s30, %s125_s26  ;;  %s253_s14 = sld [smem:[#allocation8 + $0x3]] }
  0x21   :  { %s67_s15 = sadd.f32 %s66_s12, %s64_s9  ;;  %s72_s18 = smul.f32 %s243_s5, %s62_s11 }
  0x22   :  { %s133_s16 = sld [smem:[#allocation2 + $0x3]] }
  0x23   :  { %s70_s17 = sadd.f32 %s69_s13, %s67_s15 }
  0x24   :  { %s134_s19 = sld [smem:[#allocation2 + $0x4]]  ;;  %s77_s20 = smul.f32 %s249_s10, %s62_s11 }
  0x25   :  { %s135_s21 = sld [smem:[#allocation2 + $0x5]]  ;;  %s74_s22 = smul.f32 %s245_s6, %s70_s17 }
  0x26   :  { %s79_s23 = smul.f32 %s253_s14, %s70_s17 }
  0x27   :  { %s75_s28 = sadd.f32 %s74_s22, %s72_s18 }
  0x28   :  { %s83_s0 = smul.f32 %s133_s16, %s229_s1  ;;  %s80_s9 = sadd.f32 %s79_s23, %s77_s20 }
  0x29   :  { %s90_s24 = smul.f32 %s133_s16, %s235_s27  ;;  %s199_s20 = smov [#allocation9]  }
  0x2a   :  { %s85_s26 = smul.f32 %s134_s19, %s231_s25  ;;  %s81_s1 = sadd.f32 %s80_s9, %s75_s28 }
  0x2b   :  { %s88_s4 = smul.f32 %s135_s21, %s233_s2  ;;  %s277_s2 = sld [smem:[#allocation14_spill]] }
  0x2c   :  { %s86_s7 = sadd.f32 %s85_s26, %s83_s0  ;;  %s91_s8 = smul.f32 %s134_s19, %s238_s29 }
  0x2d   :  { %s93_s12 = smul.f32 %s135_s21, %s240_s30 }
  0x2e   :  { %s89_s13 = sadd.f32 %s88_s4, %s86_s7 }
  0x2f   :  { %s92_s15 = sadd.f32 %s91_s8, %s90_s24 }
  0x30   :  { %s95_s11 = smul.f32 %s89_s13, %s243_s5 }
  0x31   :  { %s94_s3 = sadd.f32 %s93_s12, %s92_s15  ;;  %s99_s17 = smul.f32 %s249_s10, %s89_s13 }
  0x32   :  { %s110_s0 = sshll.u32 %s277_s2, 4  ;;  %s111_s0 = int_to_ptr.hbm [resolvable:$true] %s110_s0 }
  0x33   :  { %s96_s16 = smul.f32 %s245_s6, %s94_s3 }
  0x34   :  { %s100_s27 = smul.f32 %s253_s14, %s94_s3 }
  0x35   :  { %s97_s25 = sadd.f32 %s96_s16, %s95_s11 }
  0x36   :  { %s101_s26 = sadd.f32 %s100_s27, %s99_s17 }
  0x37   :  { %s98_s19 = sadd.f32 %s97_s25, %s81_s1 }
  0x39   :  { %s102_s29 = sadd.f32 %s101_s26, %s98_s19 }
  0x3b   :  { %104 = sst [smem:[#allocation9]] %s102_s29 }
  0x3c   :  { %113 = dma.smem_to_hbm %s199_s20, 16, %s111_s0, [#allocation4]  }
  0x3d   :  { %194 = dma.done.wait [#allocation4], 16  }
  0x3e   :  { %195 = vsyncadd [#allocation4], 4294967280 }
  0x3f   :  { %118 = sfence }
  0x40   :  { %119 = vsyncpa [#allocation3], 1 }
  0x41   :  { %120 = vsyncpa [#allocation7], 1 }
  0x42   :  { %121 = vsyncpa [#allocation4], 1 }
  0x43   :  { %122 = vsyncpa [#allocation5], 1 }

</bundles_post_ra>
